<compile_context>
chip_gen: v7x
topology: tpu7x:2x2x1
jax: 0.10.0
libtpu: 0.0.40
codegen_flags: <defaults>
</compile_context>

<pallas_src>
import jax
import jax.numpy as jnp
from jax.experimental import pallas as pl
from jax.experimental.pallas import tpu as pltpu

_HIDDEN = 64      # nn.Linear(state_dim, 64)
_LANE = 128       # TPU lane width (feature dims padded to this for the MXU)
_SUBLANE = 8      # f32 sublane tile


def _round_up(n, m):
    return (n + m - 1) // m * m


def _dqn_kernel(x_ref, w1_ref, b1_ref, w2_ref, b2_ref, o_ref):
    """Fused fc1 -> relu -> fc2 on one (TB, S) batch tile.

    Weight operands are lane-padded to 128 so both MXU matmuls see full-width
    tiles; the HBM output block is the *real* action width, so only the first
    A lanes of the fc2 result are stored.
    """
    # fc1: (TB, S) @ (S, Hp) -> f32 (TB, Hp) on the MXU.
    h = jnp.dot(x_ref[...], w1_ref[...], preferred_element_type=jnp.float32)
    h = jnp.maximum(h + b1_ref[...], 0.0)            # bias + ReLU in f32 (VPU)
    # fc2: (TB, Hp) @ (Hp, Ap) -> f32 (TB, Ap); operand dtype matches w2
    # (bf16 on the fast path), accumulation stays f32.
    out = jnp.dot(h.astype(w2_ref.dtype), w2_ref[...],
                  preferred_element_type=jnp.float32)
    # Store only the real action lanes: output HBM block is (TB, A).
    A = o_ref.shape[1]
    o_ref[...] = (out[:, :A] + b2_ref[...]).astype(o_ref.dtype)


def _dqn_pallas(x, w1p, b1p, w2p, b2p, *, block_batch, out_dtype):
    """relu(x @ w1 + b1) @ w2 + b2 with pre-padded params."""
    B, S = x.shape
    Hp = w1p.shape[1]
    Ap = w2p.shape[1]
    A = b2p.shape[1]

    # Tile choice: kernel is HBM/overhead bound, so take big tiles, but keep
    # >=2 grid steps when the batch allows it so v7x megacore sharding engages.
    if B <= 2 * _SUBLANE:
        TB = _round_up(B, _SUBLANE)
    else:
        TB = min(block_batch, _round_up((B + 1) // 2, _SUBLANE))
    Bp = _round_up(B, TB)

    xc = x.astype(w1p.dtype)
    if Bp != B:
        # Ragged last tile only; common power-of-two batches skip this copy.
        xc = jnp.pad(xc, ((0, Bp - B), (0, 0)))

    out = pl.pallas_call(
        _dqn_kernel,
        out_shape=jax.ShapeDtypeStruct((Bp, A), out_dtype),
        grid_spec=pltpu.PrefetchScalarGridSpec(
            num_scalar_prefetch=0,
            grid=(Bp // TB,),
            in_specs=[
                # Batch tiles stream; params keep a constant block index so
                # they are DMA'd once and stay VMEM-resident across the grid.
                pl.BlockSpec((TB, S), lambda i: (i, 0)),
                pl.BlockSpec((S, Hp), lambda i: (0, 0)),
                pl.BlockSpec((1, Hp), lambda i: (0, 0)),
                pl.BlockSpec((Hp, Ap), lambda i: (0, 0)),
                pl.BlockSpec((1, A), lambda i: (0, 0)),
            ],
            out_specs=pl.BlockSpec((TB, A), lambda i: (i, 0)),
        ),
        compiler_params=pltpu.CompilerParams(
            # Independent batch tiles -> shard across TensorCores on v7x.
            dimension_semantics=("parallel",),
        ),
    )(xc, w1p, b1p, w2p, b2p)

    return out[:B] if Bp != B else out


def make_dqn_forward(w1, b1, w2, b2, *, block_batch=4096,
                     compute_dtype=jnp.bfloat16, out_dtype=jnp.float32):
    """Pad/cast the params once (cached on device) and return jitted x -> Q(x).

    w1: (state_dim, 64)  b1: (64,)  w2: (64, action_dim)  b2: (action_dim,)
    Returned fn maps x: (B, state_dim) -> (B, action_dim) in out_dtype.

    compute_dtype=jnp.bfloat16 (default) halves operand HBM traffic on every
    TPU generation; accumulation and bias/ReLU stay f32. Use jnp.float32 for
    strict f32 numerics.
    """
    S, H = w1.shape
    A = w2.shape[1]
    Hp = _round_up(H, _LANE)
    Ap = _round_up(A, _LANE)

    w1p = jnp.zeros((S, Hp), compute_dtype).at[:, :H].set(w1.astype(compute_dtype))
    w2p = jnp.zeros((Hp, Ap), compute_dtype).at[:H, :A].set(w2.astype(compute_dtype))
    b1p = jnp.zeros((1, Hp), jnp.float32).at[0, :H].set(b1.astype(jnp.float32))
    b2p = jnp.reshape(b2.astype(jnp.float32), (1, A))

    @jax.jit
    def forward(x):
        return _dqn_pallas(x, w1p, b1p, w2p, b2p,
                           block_batch=block_batch, out_dtype=out_dtype)

    return forward


def init_dqn_params(key, state_dim, action_dim, hidden=_HIDDEN,
                    dtype=jnp.float32):
    """Deterministic init mimicking nn.Linear's uniform(-1/sqrt(in), 1/sqrt(in))."""
    k1, k2, k3, k4 = jax.random.split(key, 4)
    bound1 = 1.0 / jnp.sqrt(state_dim)
    bound2 = 1.0 / jnp.sqrt(hidden)
    # Stored as (in, out) == transposed PyTorch layout, so kernel does x @ W + b.
    w1 = jax.random.uniform(k1, (state_dim, hidden), dtype, -bound1, bound1)
    b1 = jax.random.uniform(k2, (hidden,), dtype, -bound1, bound1)
    w2 = jax.random.uniform(k3, (hidden, action_dim), dtype, -bound2, bound2)
    b2 = jax.random.uniform(k4, (action_dim,), dtype, -bound2, bound2)
    return w1, b1, w2, b2


if __name__ == "__main__":
    state_dim, action_dim, batch = 32, 8, 16

    key = jax.random.PRNGKey(0)
    kx, kp = jax.random.split(key)
    x = jax.random.normal(kx, (batch, state_dim), jnp.float32)
    w1, b1, w2, b2 = init_dqn_params(kp, state_dim, action_dim)

    # Reference in plain JAX (f32).
    ref = jnp.maximum(x @ w1 + b1, 0.0) @ w2 + b2

    # Default fast path: bf16 operands, f32 accumulation.
    fwd = make_dqn_forward(w1, b1, w2, b2)
    out = jax.block_until_ready(fwd(x))
    assert out.shape == (batch, action_dim)
    assert jnp.allclose(out, ref, atol=5e-2, rtol=5e-2)

    # Strict f32 path matches the reference tightly.
    fwd32 = make_dqn_forward(w1, b1, w2, b2, compute_dtype=jnp.float32)
    out32 = jax.block_until_ready(fwd32(x))
    assert out32.shape == (batch, action_dim)
    assert jnp.allclose(out32, ref, atol=1e-5, rtol=1e-5)

    print("KERNEL_OK")
</pallas_src>

<mosaic_0001>
module attributes {stable_mosaic.version = 11 : i64} {
  func.func @_dqn_kernel(%arg0: i32, %arg1: memref<16x32xbf16, #tpu.memory_space<vmem>>, %arg2: memref<32x128xbf16, #tpu.memory_space<vmem>>, %arg3: memref<1x128xf32, #tpu.memory_space<vmem>>, %arg4: memref<128x128xbf16, #tpu.memory_space<vmem>>, %arg5: memref<1x8xf32, #tpu.memory_space<vmem>>, %arg6: memref<16x8xf32, #tpu.memory_space<vmem>>) attributes {dimension_semantics = [#tpu.dimension_semantics<parallel>], iteration_bounds = array<i64: 1>, scalar_prefetch = 0 : i64, scratch_operands = 0 : i64, tpu.core_type = #tpu.core_type<tc>, window_params = [{transform_indices = @transform_0, window_bounds = array<i64: 16, 32>}, {pipeline_mode = #tpu.pipeline_mode<synchronous>, transform_indices = @transform_1, window_bounds = array<i64: 32, 128>}, {pipeline_mode = #tpu.pipeline_mode<synchronous>, transform_indices = @transform_2, window_bounds = array<i64: 1, 128>}, {pipeline_mode = #tpu.pipeline_mode<synchronous>, transform_indices = @transform_3, window_bounds = array<i64: 128, 128>}, {pipeline_mode = #tpu.pipeline_mode<synchronous>, transform_indices = @transform_4, window_bounds = array<i64: 1, 8>}, {transform_indices = @transform_5, window_bounds = array<i64: 16, 8>}]} {
    %c0 = arith.constant 0 : index
    %c0_0 = arith.constant 0 : index
    %0 = vector.load %arg1[%c0, %c0_0] : memref<16x32xbf16, #tpu.memory_space<vmem>>, vector<16x32xbf16>
    %c0_1 = arith.constant 0 : index
    %c0_2 = arith.constant 0 : index
    %1 = vector.load %arg2[%c0_1, %c0_2] : memref<32x128xbf16, #tpu.memory_space<vmem>>, vector<32x128xbf16>
    %cst = arith.constant dense<0.000000e+00> : vector<16x128xf32>
    %2 = tpu.matmul %0, %1, %cst {dimension_numbers = #tpu.dot_dimension_numbers<[1], [0], [0], [1], [0, 0, 1, 1], [], []>} : vector<16x32xbf16>, vector<32x128xbf16>, vector<16x128xf32> -> vector<16x128xf32>
    %c0_3 = arith.constant 0 : index
    %c0_4 = arith.constant 0 : index
    %3 = vector.load %arg3[%c0_3, %c0_4] : memref<1x128xf32, #tpu.memory_space<vmem>>, vector<1x128xf32>
    %4 = vector.broadcast %3 : vector<1x128xf32> to vector<16x128xf32>
    %5 = arith.addf %2, %4 : vector<16x128xf32>
    %cst_5 = arith.constant 0.000000e+00 : f32
    %6 = vector.broadcast %cst_5 : f32 to vector<16x128xf32>
    %7 = arith.maximumf %5, %6 : vector<16x128xf32>
    %8 = arith.truncf %7 : vector<16x128xf32> to vector<16x128xbf16>
    %c0_6 = arith.constant 0 : index
    %c0_7 = arith.constant 0 : index
    %9 = vector.load %arg4[%c0_6, %c0_7] : memref<128x128xbf16, #tpu.memory_space<vmem>>, vector<128x128xbf16>
    %cst_8 = arith.constant dense<0.000000e+00> : vector<16x128xf32>
    %10 = tpu.matmul %8, %9, %cst_8 {dimension_numbers = #tpu.dot_dimension_numbers<[1], [0], [0], [1], [0, 0, 1, 1], [], []>} : vector<16x128xbf16>, vector<128x128xbf16>, vector<16x128xf32> -> vector<16x128xf32>
    %11 = vector.extract_strided_slice %10 {offsets = [0, 0], sizes = [16, 8], strides = [1, 1]} : vector<16x128xf32> to vector<16x8xf32>
    %c0_9 = arith.constant 0 : index
    %c0_10 = arith.constant 0 : index
    %12 = vector.load %arg5[%c0_9, %c0_10] : memref<1x8xf32, #tpu.memory_space<vmem>>, vector<1x8xf32>
    %13 = vector.broadcast %12 : vector<1x8xf32> to vector<16x8xf32>
    %14 = arith.addf %11, %13 : vector<16x8xf32>
    %c0_11 = arith.constant 0 : index
    %c0_12 = arith.constant 0 : index
    %15 = vector.load %arg6[%c0_11, %c0_12] : memref<16x8xf32, #tpu.memory_space<vmem>>, vector<16x8xf32>
    tpu.vector_store %arg6[%c0_11, %c0_12], %14 {strides = array<i32>} : memref<16x8xf32, #tpu.memory_space<vmem>>, vector<16x8xf32>,
    return
  }
  func.func @transform_0(%arg0: i32) -> (i32, i32) {
    %c0_i32 = arith.constant 0 : i32
    %c0_i32_0 = arith.constant 0 : i32
    return %arg0, %c0_i32 : i32, i32
  }
  func.func @transform_1(%arg0: i32) -> (i32, i32) {
    %c0_i32 = arith.constant 0 : i32
    %c0_i32_0 = arith.constant 0 : i32
    %c0_i32_1 = arith.constant 0 : i32
    return %c0_i32, %c0_i32_0 : i32, i32
  }
  func.func @transform_2(%arg0: i32) -> (i32, i32) {
    %c0_i32 = arith.constant 0 : i32
    %c0_i32_0 = arith.constant 0 : i32
    %c0_i32_1 = arith.constant 0 : i32
    return %c0_i32, %c0_i32_0 : i32, i32
  }
  func.func @transform_3(%arg0: i32) -> (i32, i32) {
    %c0_i32 = arith.constant 0 : i32
    %c0_i32_0 = arith.constant 0 : i32
    %c0_i32_1 = arith.constant 0 : i32
    return %c0_i32, %c0_i32_0 : i32, i32
  }
  func.func @transform_4(%arg0: i32) -> (i32, i32) {
    %c0_i32 = arith.constant 0 : i32
    %c0_i32_0 = arith.constant 0 : i32
    %c0_i32_1 = arith.constant 0 : i32
    return %c0_i32, %c0_i32_0 : i32, i32
  }
  func.func @transform_5(%arg0: i32) -> (i32, i32) {
    %c0_i32 = arith.constant 0 : i32
    %c0_i32_0 = arith.constant 0 : i32
    return %arg0, %c0_i32 : i32, i32
  }
}

</mosaic_0001>

<bundles_post_ra>
// kernel: forward.1
= control target key start
LH: loop header
LB: loop body
LE: loop exit
PB: predicated region body
PF: predicated region fallthrough
CT: control target
= control target key end

     0   :  { %10 = vsyncpa [#allocation3], 0  ;;  %s329_s18 = smov [#allocation2]   ;;  %s397_s0 = inlined_call_operand.vmem [shape: bf16[16,32], index: 0, kind: input, shape index: {}]   ;;  %s398_s1 = inlined_call_operand.vmem [shape: bf16[32,128], index: 1, kind: input, shape index: {}]   ;;  %s399_s2 = inlined_call_operand.vmem [shape: f32[1,128], index: 2, kind: input, shape index: {}]   ;;  %s400_s3 = inlined_call_operand.hbm [shape: bf16[128,128], index: 3, kind: input, shape index: {}]   ;;  %s401_s4 = inlined_call_operand.vmem [shape: f32[1,8], index: 4, kind: input, shape index: {}]   ;;  %s402_s5 = inlined_call_operand.vmem [shape: f32[16,8], index: 5, kind: output, shape index: {}]  }
   0x1   :  { %s22_s19 = sshll.u32 %s329_s18, 4  ;;  %s305_s22 = scalar_lea.hbm %s400_s3, 1024  ;;  %s23_s19 = int_to_ptr.vmem [resolvable:$true] %s22_s19 }
   0x2   :  { %p306_p0 = scmp.ne.s32.totalorder %s400_s3, %s305_s22  ;;  %p309_p1 = scmp.lt.u32.totalorder %s305_s22, %s400_s3 }
   0x4   :  { %p311_p2 = pnand %p309_p1, %p306_p0 }
   0x6   :  { %314 = shalt.err (!%p311_p2)
}
   0x7   :  { %s315_s27 = scalar_lea.vmem %s23_s19, 1024  ;;  %p320_p4 = scmp.lt.s32.totalorder %s23_s19, %s23_s19 }
   0x8   :  { %p316_p3 = scmp.ne.s32.totalorder %s23_s19, %s315_s27  ;;  %p321_p5 = scmp.lt.s32.totalorder %s315_s27, %s315_s27 }
   0xa   :  { %p322_p6 = por %p321_p5, %p320_p4 }
   0xc   :  { %p323_p7 = pnand %p322_p6, %p316_p3 }
   0xe   :  { %326 = shalt.err (!%p323_p7)
}
   0xf   :  { %s330_s28 = smov 64   ;;  %s331_s29 = smov 4  }
  0x10   :  { %28 = dma.hbm_to_vmem [thread:$0]  %s400_s3, 1024, %s23_s19, [#allocation3], %s330_s28, %s330_s28, %s331_s29  }
  0x11   :  { %327 = dma.done.wait [#allocation3], 1024  }
  0x12   :  { %328 = vsyncadd [#allocation3], 4294966272  ;;  %v332_v0 = vmov 0.0   ;;  %vm333_vm0 = vmmov 0   ;;  %v294_v1 = vld [vmem:[%s398_s1] sm:$0xff]   ;;  %v295_v2 = vld [vmem:[%s398_s1 + $0x8] sm:$0xff]  }
  0x13   :  { %261 = vmatprep.subr.bf16.mxu0 %v332_v0  ;;  %265 = vmatprep.mubr.msk.bf16.mxu0 %vm333_vm0, %v332_v0  ;;  %v297_v3 = vld [vmem:[#allocation2] sm:$0xff]   ;;  %v298_v5 = vld [vmem:[#allocation2 + $0x8] sm:$0xff]   ;;  %vm65_vm1 = vcmask 261120   ;;  %v299_v6 = vld [vmem:[#allocation2 + $0x10] sm:$0xff]   ;;  %vm227_vm2 = vcmask 64512  }
  0x14   :  { %269 = vmatprep.subr.bf16.mxu1 %v332_v0  ;;  %285 = vmatprep.mubr.msk.bf16.mxu1 %vm333_vm0, %v332_v0  ;;  %v296_v4 = vld [vmem:[%s397_s0] sm:$0xff]   ;;  %v300_v7 = vld [vmem:[#allocation2 + $0x18] sm:$0xff]   ;;  %v302_v9 = vld [vmem:[#allocation2 + $0x28] sm:$0xff]  }
  0x15   :  { %262 = vmatpush3.bf16.msra.mxu0 %v294_v1  ;;  %270 = vmatpush3.bf16.msra.mxu1 %v297_v3  ;;  %v301_v8 = vld [vmem:[#allocation2 + $0x20] sm:$0xff]   ;;  %v303_v10 = vld [vmem:[#allocation2 + $0x30] sm:$0xff]   ;;  %v304_v11 = vld [vmem:[#allocation2 + $0x38] sm:$0xff]  }
  0x16   :  { %263 = vmatprep.subr.bf16.mxu0 %v332_v0  ;;  %271 = vmatprep.subr.bf16.mxu1 %v332_v0  ;;  %v235_v12 = vld [vmem:[%s399_s2] ss:$0 sm:$0xff] }
  0x17   :  { %v248_v22 = vld [vmem:[%s401_s4] ss:$0 sm:$0xff] }
  0x19   :  { %264 = vmatpush3.bf16.msra.mxu0 %v295_v2  ;;  %272 = vmatpush3.bf16.msra.mxu1 %v298_v5 }
  0x1a   :  { %273 = vmatprep.subr.bf16.mxu1 %v332_v0 }
  0x1c   :  { %266 = vmatmul.mubr.msk.bf16.vlgmr.msra.gmra.mrb[0].mxu0 %vm65_vm1, %v296_v4 }
  0x1d   :  { %274 = vmatpush3.bf16.msra.mxu1 %v299_v6 }
  0x1e   :  { %275 = vmatprep.subr.bf16.mxu1 %v332_v0 }
  0x21   :  { %276 = vmatpush3.bf16.msra.mxu1 %v300_v7 }
  0x22   :  { %277 = vmatprep.subr.bf16.mxu1 %v332_v0 }
  0x25   :  { %278 = vmatpush3.bf16.msra.mxu1 %v301_v8 }
  0x26   :  { %279 = vmatprep.subr.bf16.mxu1 %v332_v0 }
  0x29   :  { %280 = vmatpush3.bf16.msra.mxu1 %v302_v9 }
  0x2a   :  { %281 = vmatprep.subr.bf16.mxu1 %v332_v0 }
  0x2d   :  { %282 = vmatpush3.bf16.msra.mxu1 %v303_v10 }
  0x2e   :  { %283 = vmatprep.subr.bf16.mxu1 %v332_v0 }
  0x31   :  { %284 = vmatpush3.bf16.msra.mxu1 %v304_v11 }
  0xef   :  { %v103_v13 = vpop.f32.mrb[0].mxu0 }
  0xf0   :  { %v104_v14 = vadd.f32 %v235_v12, %v103_v13  ;;  %v267_v15 = vpop.f32.mrb[1].mxu0 }
  0xf1   :  { %v106_v16 = vpop.f32.mrb[2].mxu0 }
  0xf2   :  { %v107_v17 = vadd.f32 %v235_v12, %v106_v16  ;;  %v268_v18 = vpop.f32.mrb[3].mxu0  ;;  %v110_v19 = vmax.f32 %v104_v14, 0.0 }
  0xf4   :  { %v111_v20 = vmax.f32 %v107_v17, 0.0 }
  0xf6   :  { %v112_v21 = vpack.c.bf16 %v111_v20, %v110_v19 }
  0xf8   :  { %286 = vmatmul.mubr.bf16.vlgmr.msra.gmra.mrb[0].mxu1 %v112_v21 }
 0x1cb   :  { %v211_v23 = vpop.f32.mrb[0].mxu1 }
 0x1cc   :  { %v225_v24 = vadd.f32 %v248_v22, %v211_v23  ;;  %v287_v25 = vpop.f32.mrb[1].mxu1 }
 0x1cd   :  { %v214_v26 = vpop.f32.mrb[2].mxu1 }
 0x1ce   :  { %228 = vst.msk [vmem:[%s402_s5] sm:$0xff] %vm227_vm2, %v225_v24  ;;  %v226_v27 = vadd.f32 %v248_v22, %v214_v26  ;;  %v288_v28 = vpop.f32.mrb[3].mxu1 }
 0x1d0   :  { %229 = vst.msk [vmem:[%s402_s5 + $0x8] sm:$0xff] %vm227_vm2, %v226_v27 }
 0x1d1   :  { %234 = vsyncpa [#allocation3], 1 }

</bundles_post_ra>
